<compile_context>
chip_gen: v7x
topology: tpu7x:2x2x1
jax: 0.10.0
libtpu: 0.0.40
codegen_flags: <defaults>
</compile_context>

<pallas_src>
import functools

import jax
import jax.numpy as jnp
from jax.experimental import pallas as pl
from jax.experimental.pallas import tpu as pltpu

LANES = 128
_PACKED_WEIGHT_BYTE_CAP = 4 << 20   # keep kron-inflated (pack^2) weights tiny
_TARGET_TILE_BYTES = 2 << 20        # ~2 MiB of x per grid step (amortizes ~0.35us/step)


def _round_up(x, m):
    return (x + m - 1) // m * m


def _vmem_cap_bytes():
    """Generation-aware scoped-VMEM ceiling (v7x has only 64 MiB per TensorCore)."""
    try:
        phys = int(pltpu.get_tpu_info().vmem_capacity_bytes)
    except Exception:
        phys = 64 << 20                      # conservative: v7x per-TC VMEM
    return min(int(phys * 0.8), 100 << 20)


# ---------------------------------------------------------------------------
# Kernel
# ---------------------------------------------------------------------------
def _fc_kernel(x_ref, w1_ref, b1_ref, w2_ref, b2_ref, w3_ref, b3_ref, o_ref):
    """Fused 3-layer MLP on one row tile; weights stay VMEM-resident."""
    mm_dtype = w1_ref.dtype                       # bf16 (or f32) matmul operands
    x = x_ref[...].astype(mm_dtype)               # cast in-kernel: x HBM stream stays 1 pass
    h1 = jnp.dot(x, w1_ref[...], preferred_element_type=jnp.float32) + b1_ref[...]
    h1 = jnp.maximum(h1, 0.0)                     # bias / ReLU in f32
    h2 = jnp.dot(h1.astype(mm_dtype), w2_ref[...],
                 preferred_element_type=jnp.float32) + b2_ref[...]
    h2 = jnp.maximum(h2, 0.0)
    y = jnp.dot(h2.astype(mm_dtype), w3_ref[...],
                preferred_element_type=jnp.float32) + b3_ref[...]
    o_ref[...] = y.astype(o_ref.dtype)


# ---------------------------------------------------------------------------
# One-time parameter packing (hoisted out of the hot path)
# ---------------------------------------------------------------------------
def _kron_pack(w, pack, dtype):
    """Block-diagonal replication kron(I_pack, W); pack == 1 -> plain cast."""
    if pack == 1:
        return w.astype(dtype)
    eye = jnp.eye(pack, dtype=w.dtype)
    return jnp.kron(eye, w).astype(dtype)


def _tile_bias(b, pack):
    b = b.astype(jnp.float32)
    return b if pack == 1 else jnp.tile(b, (1, pack))


def pack_fc_params(params, num_tokens, matmul_dtype=jnp.bfloat16):
    """Pre-pack FC params for the Pallas kernel.  Call once; reuse across forwards.

    Returns (packed_params, meta) with meta = (pack, out_dim, out_pad) (static ints).
    """
    w1, b1, w2, b2, w3, b3 = params
    d_in, h1 = w1.shape
    h2, out_dim = w3.shape
    itemsize = jnp.dtype(matmul_dtype).itemsize

    def weight_bytes(p, o_pad):
        return p * p * (d_in * h1 + h1 * h2 + h2 * o_pad) * itemsize

    # 1) Smallest pack that makes the *output* store lane-dense (pack*out_dim % 128 == 0).
    pack, out_pad = 1, out_dim
    for p in (1, 2, 4, 8, 16):
        if ((p * out_dim) % LANES == 0 and num_tokens % p == 0
                and weight_bytes(p, out_dim) <= _PACKED_WEIGHT_BYTE_CAP):
            pack = p
            break
    else:
        # No small pack works -> pad the output feature dim to a lane multiple instead.
        pack, out_pad = 1, _round_up(out_dim, LANES)

    # 2) Optionally bump pack further so the *input* is lane-dense too (pack*D_in >= 128).
    while (pack * d_in < LANES and 2 * pack <= 16
           and num_tokens % (2 * pack) == 0
           and weight_bytes(2 * pack, out_pad) <= _PACKED_WEIGHT_BYTE_CAP):
        pack *= 2

    if out_pad != out_dim:
        w3 = jnp.pad(w3, ((0, 0), (0, out_pad - out_dim)))
        b3 = jnp.pad(b3, ((0, 0), (0, out_pad - out_dim)))

    packed = (
        _kron_pack(w1, pack, matmul_dtype), _tile_bias(b1, pack),
        _kron_pack(w2, pack, matmul_dtype), _tile_bias(b2, pack),
        _kron_pack(w3, pack, matmul_dtype), _tile_bias(b3, pack),
    )
    return packed, (pack, int(out_dim), int(out_pad))


# ---------------------------------------------------------------------------
# Tiling / forward
# ---------------------------------------------------------------------------
def _choose_row_tile(np_rows, dp_in):
    """Packed rows per grid step, derived from a per-step HBM byte budget."""
    if np_rows <= 8:
        return np_rows                                   # one full block (== array dim)
    t = max(8, _TARGET_TILE_BYTES // (dp_in * 4))
    t = (t // 256) * 256 if t >= 256 else (t // 8) * 8   # 256-align for the 256x256 MXU
    # Keep the grid at >= 2 steps so the "parallel" axis can shard across both v7x TCs.
    t = min(t, _round_up(pl.cdiv(np_rows, 2), 8))
    return max(8, min(t, _round_up(np_rows, 8)))


def _weight_spec(shape):
    """Constant-index (VMEM-resident) block: fetched once, single-buffered."""
    try:
        return pl.BlockSpec(shape, lambda i: (0, 0), pipeline_mode=pl.Buffered(1))
    except Exception:  # older/newer API without pipeline_mode -> default double buffer
        return pl.BlockSpec(shape, lambda i: (0, 0))


@functools.partial(jax.jit, static_argnames=("meta",))
def fc_forward_packed(text, packed_params, meta):
    """Applies the packed FC MLP to `text` of shape (B, S, D_in); returns (B, S, out_dim)."""
    pack, out_dim, out_pad = meta
    w1p, b1p, w2p, b2p, w3p, b3p = packed_params
    B, S, d_in = text.shape
    N = B * S
    assert N % pack == 0, "pack_fc_params was built for a different token count"

    Np = N // pack
    Dp_in, Hp1 = w1p.shape
    Hp2, Dp_out = w3p.shape
    assert Dp_in == pack * d_in and Dp_out == pack * out_pad

    # Byte-identical row-major repack of the token stream (metadata only, no copy).
    x2d = text.reshape(Np, Dp_in)

    # ---- tile sizing from a byte budget, then shrink to fit the VMEM cap ----
    mm_size = jnp.dtype(w1p.dtype).itemsize
    w_bytes = (Dp_in * Hp1 + Hp1 * Hp2 + Hp2 * Dp_out) * mm_size   # Buffered(1): 1 copy
    b_bytes = (Hp1 + Hp2 + Dp_out) * 4
    vmem_cap = _vmem_cap_bytes()
    if w_bytes + b_bytes > int(0.6 * vmem_cap):
        # TODO(synk): switch to hidden/out-dim tiling with a K-reduction grid axis
        # ("arbitrary") + f32 VMEM accumulator; needed much earlier on v7x (64 MiB/TC).
        raise NotImplementedError("FC weights too large for the weight-resident kernel")

    def tile_footprint(t):
        io = 2 * t * (Dp_in + Dp_out) * 4                 # double-buffered x / out tiles
        act = t * (Dp_in + Hp1 + Hp2) * (4 + mm_size)     # f32 activations + bf16 casts
        return io + act

    tile_p = _choose_row_tile(Np, Dp_in)
    while tile_p > 8 and w_bytes + b_bytes + tile_footprint(tile_p) > int(0.85 * vmem_cap):
        tile_p = max(8, _round_up(tile_p // 2, 8))

    grid = (pl.cdiv(Np, tile_p),)            # tail rows handled by Pallas partial blocks

    vmem_limit = min(
        vmem_cap,
        max(16 << 20,
            int(1.4 * (w_bytes + b_bytes + tile_footprint(tile_p))) + (2 << 20)))

    # Cost estimate includes the pack-inflated (zero-block) MXU work and padded writeback.
    flops = 2 * Np * (Dp_in * Hp1 + Hp1 * Hp2 + Hp2 * Dp_out)
    bytes_accessed = int(Np * (Dp_in + Dp_out) * 4 + w_bytes + b_bytes)

    out_packed = pl.pallas_call(
        _fc_kernel,
        out_shape=jax.ShapeDtypeStruct((Np, Dp_out), text.dtype),
        grid_spec=pltpu.PrefetchScalarGridSpec(
            num_scalar_prefetch=0,
            grid=grid,
            in_specs=[
                pl.BlockSpec((tile_p, Dp_in), lambda i: (i, 0)),   # x tile (streamed)
                _weight_spec((Dp_in, Hp1)),                        # W1 (VMEM resident)
                _weight_spec((1, Hp1)),                            # b1
                _weight_spec((Hp1, Hp2)),                          # W2
                _weight_spec((1, Hp2)),                            # b2
                _weight_spec((Hp2, Dp_out)),                       # W3
                _weight_spec((1, Dp_out)),                         # b3
            ],
            out_specs=pl.BlockSpec((tile_p, Dp_out), lambda i: (i, 0)),
        ),
        compiler_params=pltpu.CompilerParams(
            dimension_semantics=("parallel",),
            vmem_limit_bytes=int(vmem_limit),
        ),
        cost_estimate=pl.CostEstimate(
            flops=flops, transcendentals=0, bytes_accessed=bytes_accessed),
    )(x2d, w1p, b1p, w2p, b2p, w3p, b3p)

    # Unpack: (Np, pack*out_pad) -> (N, out_pad) is a metadata-only reshape; the column
    # slice is a no-op whenever no output padding was needed.
    out = out_packed.reshape(N, out_pad)[:, :out_dim]
    return out.reshape(B, S, out_dim)


def fc_forward(text, params, matmul_dtype=jnp.bfloat16):
    """Convenience wrapper (re-packs every call); prefer pack_fc_params + fc_forward_packed."""
    B, S, _ = text.shape
    packed, meta = pack_fc_params(params, B * S, matmul_dtype)
    return fc_forward_packed(text, packed, meta)


# ---------------------------------------------------------------------------
# Parameters / reference
# ---------------------------------------------------------------------------
def init_fc_params(key, input_dim, out_dim, dtype=jnp.float32):
    """Deterministic parameters matching nn.Linear shapes of FC(input_dim, out_dim)."""
    h1 = out_dim // 4
    h2 = out_dim // 2
    dims = [(input_dim, h1), (h1, h2), (h2, out_dim)]
    params = []
    for din, dout in dims:
        kw, kb, key = jax.random.split(key, 3)
        bound = 1.0 / jnp.sqrt(din)  # PyTorch default init range
        w = jax.random.uniform(kw, (din, dout), dtype, -bound, bound)
        b = jax.random.uniform(kb, (1, dout), dtype, -bound, bound)
        params += [w, b]
    return tuple(params)


def fc_reference(text, params, matmul_dtype=jnp.float32):
    """Pure-JAX reference; matmul_dtype lets us mirror the kernel's bf16 operands."""
    w1, b1, w2, b2, w3, b3 = params

    def lin(x, w, b):
        return jnp.dot(x.astype(matmul_dtype), w.astype(matmul_dtype),
                       preferred_element_type=jnp.float32) + b[0]

    h1 = jnp.maximum(lin(text, w1, b1), 0.0)
    h2 = jnp.maximum(lin(h1, w2, b2), 0.0)
    return lin(h2, w3, b3)


if __name__ == "__main__":
    key = jax.random.PRNGKey(0)
    k_text, k_params = jax.random.split(key)

    B, S, input_dim, out_dim = 2, 8, 32, 64
    text = jax.random.normal(k_text, (B, S, input_dim), jnp.float32)
    text_length = jnp.full((B,), S, jnp.int32)  # unused by FC.forward, kept for parity

    params = init_fc_params(k_params, input_dim, out_dim)

    # Pack the weights once (outside the hot path), then run the jitted kernel.
    packed, meta = pack_fc_params(params, B * S)
    out = fc_forward_packed(text, packed, meta)
    out = jax.block_until_ready(out)
    assert out.shape == (B, S, out_dim)

    # Tight check vs a reference that rounds matmul operands to bf16 like the kernel.
    ref_bf16 = fc_reference(text, params, matmul_dtype=jnp.bfloat16)
    assert jnp.allclose(out, ref_bf16, atol=5e-3, rtol=5e-3), "mismatch vs bf16 reference"

    # Loose check vs the exact f32 module semantics (bf16 rounding only).
    ref_f32 = fc_reference(text, params, matmul_dtype=jnp.float32)
    assert jnp.allclose(out, ref_f32, atol=1e-1, rtol=1e-1), "mismatch vs f32 reference"

    print("KERNEL_OK")
</pallas_src>

<mosaic_0001>
module attributes {stable_mosaic.version = 11 : i64} {
  func.func @_fc_kernel(%arg0: i32, %arg1: memref<4x128xf32, #tpu.memory_space<vmem>>, %arg2: memref<128x64xbf16, #tpu.memory_space<vmem>>, %arg3: memref<1x64xf32, #tpu.memory_space<vmem>>, %arg4: memref<64x128xbf16, #tpu.memory_space<vmem>>, %arg5: memref<1x128xf32, #tpu.memory_space<vmem>>, %arg6: memref<128x256xbf16, #tpu.memory_space<vmem>>, %arg7: memref<1x256xf32, #tpu.memory_space<vmem>>, %arg8: memref<4x256xf32, #tpu.memory_space<vmem>>) attributes {dimension_semantics = [#tpu.dimension_semantics<parallel>], iteration_bounds = array<i64: 1>, scalar_prefetch = 0 : i64, scratch_operands = 0 : i64, tpu.core_type = #tpu.core_type<tc>, window_params = [{transform_indices = @transform_0, window_bounds = array<i64: 4, 128>}, {pipeline_mode = #tpu.pipeline_mode<synchronous>, transform_indices = @transform_1, window_bounds = array<i64: 128, 64>}, {pipeline_mode = #tpu.pipeline_mode<synchronous>, transform_indices = @transform_2, window_bounds = array<i64: 1, 64>}, {pipeline_mode = #tpu.pipeline_mode<synchronous>, transform_indices = @transform_3, window_bounds = array<i64: 64, 128>}, {pipeline_mode = #tpu.pipeline_mode<synchronous>, transform_indices = @transform_4, window_bounds = array<i64: 1, 128>}, {pipeline_mode = #tpu.pipeline_mode<synchronous>, transform_indices = @transform_5, window_bounds = array<i64: 128, 256>}, {pipeline_mode = #tpu.pipeline_mode<synchronous>, transform_indices = @transform_6, window_bounds = array<i64: 1, 256>}, {transform_indices = @transform_7, window_bounds = array<i64: 4, 256>}]} {
    %c0 = arith.constant 0 : index
    %c0_0 = arith.constant 0 : index
    %0 = vector.load %arg1[%c0, %c0_0] : memref<4x128xf32, #tpu.memory_space<vmem>>, vector<4x128xf32>
    %1 = arith.truncf %0 : vector<4x128xf32> to vector<4x128xbf16>
    %c0_1 = arith.constant 0 : index
    %c0_2 = arith.constant 0 : index
    %2 = vector.load %arg2[%c0_1, %c0_2] : memref<128x64xbf16, #tpu.memory_space<vmem>>, vector<128x64xbf16>
    %cst = arith.constant dense<0.000000e+00> : vector<4x64xf32>
    %3 = tpu.matmul %1, %2, %cst {dimension_numbers = #tpu.dot_dimension_numbers<[1], [0], [0], [1], [0, 0, 1, 1], [], []>} : vector<4x128xbf16>, vector<128x64xbf16>, vector<4x64xf32> -> vector<4x64xf32>
    %c0_3 = arith.constant 0 : index
    %c0_4 = arith.constant 0 : index
    %4 = vector.load %arg3[%c0_3, %c0_4] : memref<1x64xf32, #tpu.memory_space<vmem>>, vector<1x64xf32>
    %5 = vector.broadcast %4 : vector<1x64xf32> to vector<4x64xf32>
    %6 = arith.addf %3, %5 : vector<4x64xf32>
    %cst_5 = arith.constant 0.000000e+00 : f32
    %7 = vector.broadcast %cst_5 : f32 to vector<4x64xf32>
    %8 = arith.maximumf %6, %7 : vector<4x64xf32>
    %9 = arith.truncf %8 : vector<4x64xf32> to vector<4x64xbf16>
    %c0_6 = arith.constant 0 : index
    %c0_7 = arith.constant 0 : index
    %10 = vector.load %arg4[%c0_6, %c0_7] : memref<64x128xbf16, #tpu.memory_space<vmem>>, vector<64x128xbf16>
    %cst_8 = arith.constant dense<0.000000e+00> : vector<4x128xf32>
    %11 = tpu.matmul %9, %10, %cst_8 {dimension_numbers = #tpu.dot_dimension_numbers<[1], [0], [0], [1], [0, 0, 1, 1], [], []>} : vector<4x64xbf16>, vector<64x128xbf16>, vector<4x128xf32> -> vector<4x128xf32>
    %c0_9 = arith.constant 0 : index
    %c0_10 = arith.constant 0 : index
    %12 = vector.load %arg5[%c0_9, %c0_10] : memref<1x128xf32, #tpu.memory_space<vmem>>, vector<1x128xf32>
    %13 = vector.broadcast %12 : vector<1x128xf32> to vector<4x128xf32>
    %14 = arith.addf %11, %13 : vector<4x128xf32>
    %cst_11 = arith.constant 0.000000e+00 : f32
    %15 = vector.broadcast %cst_11 : f32 to vector<4x128xf32>
    %16 = arith.maximumf %14, %15 : vector<4x128xf32>
    %17 = arith.truncf %16 : vector<4x128xf32> to vector<4x128xbf16>
    %c0_12 = arith.constant 0 : index
    %c0_13 = arith.constant 0 : index
    %18 = vector.load %arg6[%c0_12, %c0_13] : memref<128x256xbf16, #tpu.memory_space<vmem>>, vector<128x256xbf16>
    %cst_14 = arith.constant dense<0.000000e+00> : vector<4x256xf32>
    %19 = tpu.matmul %17, %18, %cst_14 {dimension_numbers = #tpu.dot_dimension_numbers<[1], [0], [0], [1], [0, 0, 1, 1], [], []>} : vector<4x128xbf16>, vector<128x256xbf16>, vector<4x256xf32> -> vector<4x256xf32>
    %c0_15 = arith.constant 0 : index
    %c0_16 = arith.constant 0 : index
    %20 = vector.load %arg7[%c0_15, %c0_16] : memref<1x256xf32, #tpu.memory_space<vmem>>, vector<1x256xf32>
    %21 = vector.broadcast %20 : vector<1x256xf32> to vector<4x256xf32>
    %22 = arith.addf %19, %21 : vector<4x256xf32>
    %c0_17 = arith.constant 0 : index
    %c0_18 = arith.constant 0 : index
    %23 = vector.load %arg8[%c0_17, %c0_18] : memref<4x256xf32, #tpu.memory_space<vmem>>, vector<4x256xf32>
    tpu.vector_store %arg8[%c0_17, %c0_18], %22 {strides = array<i32>} : memref<4x256xf32, #tpu.memory_space<vmem>>, vector<4x256xf32>,
    return
  }
  func.func @transform_0(%arg0: i32) -> (i32, i32) {
    %c0_i32 = arith.constant 0 : i32
    %c0_i32_0 = arith.constant 0 : i32
    return %arg0, %c0_i32 : i32, i32
  }
  func.func @transform_1(%arg0: i32) -> (i32, i32) {
    %c0_i32 = arith.constant 0 : i32
    %c0_i32_0 = arith.constant 0 : i32
    %c0_i32_1 = arith.constant 0 : i32
    return %c0_i32, %c0_i32_0 : i32, i32
  }
  func.func @transform_2(%arg0: i32) -> (i32, i32) {
    %c0_i32 = arith.constant 0 : i32
    %c0_i32_0 = arith.constant 0 : i32
    %c0_i32_1 = arith.constant 0 : i32
    return %c0_i32, %c0_i32_0 : i32, i32
  }
  func.func @transform_3(%arg0: i32) -> (i32, i32) {
    %c0_i32 = arith.constant 0 : i32
    %c0_i32_0 = arith.constant 0 : i32
    %c0_i32_1 = arith.constant 0 : i32
    return %c0_i32, %c0_i32_0 : i32, i32
  }
  func.func @transform_4(%arg0: i32) -> (i32, i32) {
    %c0_i32 = arith.constant 0 : i32
    %c0_i32_0 = arith.constant 0 : i32
    %c0_i32_1 = arith.constant 0 : i32
    return %c0_i32, %c0_i32_0 : i32, i32
  }
  func.func @transform_5(%arg0: i32) -> (i32, i32) {
    %c0_i32 = arith.constant 0 : i32
    %c0_i32_0 = arith.constant 0 : i32
    %c0_i32_1 = arith.constant 0 : i32
    return %c0_i32, %c0_i32_0 : i32, i32
  }
  func.func @transform_6(%arg0: i32) -> (i32, i32) {
    %c0_i32 = arith.constant 0 : i32
    %c0_i32_0 = arith.constant 0 : i32
    %c0_i32_1 = arith.constant 0 : i32
    return %c0_i32, %c0_i32_0 : i32, i32
  }
  func.func @transform_7(%arg0: i32) -> (i32, i32) {
    %c0_i32 = arith.constant 0 : i32
    %c0_i32_0 = arith.constant 0 : i32
    return %arg0, %c0_i32 : i32, i32
  }
}

</mosaic_0001>

<bundles_post_ra>
// kernel: fc_forward_packed.1
= control target key start
LH: loop header
LB: loop body
LE: loop exit
PB: predicated region body
PF: predicated region fallthrough
CT: control target
= control target key end

     0   :  { %12 = vsyncpa [#allocation3], 0  ;;  %s543_s24 = smov [#allocation2]   ;;  %s688_s0 = inlined_call_operand.vmem [shape: f32[4,128], index: 0, kind: input, shape index: {}]   ;;  %s689_s1 = inlined_call_operand.vmem [shape: bf16[128,64], index: 1, kind: input, shape index: {}]   ;;  %s690_s2 = inlined_call_operand.vmem [shape: f32[1,64], index: 2, kind: input, shape index: {}]   ;;  %s691_s3 = inlined_call_operand.hbm [shape: bf16[64,128], index: 3, kind: input, shape index: {}]   ;;  %s692_s4 = inlined_call_operand.vmem [shape: f32[1,128], index: 4, kind: input, shape index: {}]   ;;  %s693_s5 = inlined_call_operand.vmem [shape: bf16[128,256], index: 5, kind: input, shape index: {}]   ;;  %s694_s6 = inlined_call_operand.vmem [shape: f32[1,256], index: 6, kind: input, shape index: {}]   ;;  %s695_s7 = inlined_call_operand.vmem [shape: f32[4,256], index: 7, kind: output, shape index: {}]  }
   0x1   :  { %s24_s25 = sshll.u32 %s543_s24, 4  ;;  %s519_s28 = scalar_lea.hbm %s691_s3, 512  ;;  %s25_s25 = int_to_ptr.vmem [resolvable:$true] %s24_s25 }
   0x2   :  { %p520_p0 = scmp.ne.s32.totalorder %s691_s3, %s519_s28  ;;  %p523_p1 = scmp.lt.u32.totalorder %s519_s28, %s691_s3 }
   0x4   :  { %p525_p2 = pnand %p523_p1, %p520_p0 }
   0x6   :  { %528 = shalt.err (!%p525_p2)
}
   0x7   :  { %s529_s10 = scalar_lea.vmem %s25_s25, 512  ;;  %p534_p4 = scmp.lt.s32.totalorder %s25_s25, %s25_s25 }
   0x8   :  { %p530_p3 = scmp.ne.s32.totalorder %s25_s25, %s529_s10  ;;  %p535_p5 = scmp.lt.s32.totalorder %s529_s10, %s529_s10 }
   0xa   :  { %p536_p6 = por %p535_p5, %p534_p4 }
   0xc   :  { %p537_p7 = pnand %p536_p6, %p530_p3 }
   0xe   :  { %540 = shalt.err (!%p537_p7)
}
   0xf   :  { %s544_s11 = smov 64   ;;  %s545_s12 = smov 4  }
  0x10   :  { %30 = dma.hbm_to_vmem [thread:$0]  %s691_s3, 512, %s25_s25, [#allocation3], %s544_s11, %s544_s11, %s545_s12  }
  0x11   :  { %541 = dma.done.wait [#allocation3], 512  }
  0x12   :  { %542 = vsyncadd [#allocation3], 4294966784  ;;  %v546_v0 = vmov 0.0   ;;  %vm547_vm0 = vmmov 0   ;;  %v483_v1 = vld [vmem:[%s689_s1] sm:$0xff]   ;;  %v484_v2 = vld [vmem:[%s689_s1 + $0x8] sm:$0xff]   ;;  %v259_v48 = vlaneseq }
  0x13   :  { %445 = vmatprep.subr.bf16.mxu0 %v546_v0  ;;  %461 = vmatprep.mubr.msk.bf16.mxu0 %vm547_vm0, %v546_v0  ;;  %v485_v3 = vld [vmem:[%s689_s1 + $0x10] sm:$0xff]   ;;  %v491_v4 = vld [vmem:[#allocation2] sm:$0xff]   ;;  %v486_v5 = vld [vmem:[%s689_s1 + $0x18] sm:$0xff]   ;;  %vm195_vm1 = vcmask 523264   ;;  %v548_v39 = vmov 0  }
  0x14   :  { %465 = vmatprep.subr.bf16.mxu1 %v546_v0  ;;  %473 = vmatprep.mubr.msk.bf16.mxu1 %vm547_vm0, %v546_v0  ;;  %v492_v6 = vld [vmem:[#allocation2 + $0x8] sm:$0xff]   ;;  %v487_v7 = vld [vmem:[%s689_s1 + $0x20] sm:$0xff]   ;;  %v489_v9 = vld [vmem:[%s689_s1 + $0x30] sm:$0xff]   ;;  %v260_v49 = vshrl.u32 %v259_v48, 7 }
  0x15   :  { %446 = vmatpush3.bf16.msra.mxu0 %v483_v1  ;;  %466 = vmatpush3.bf16.msra.mxu1 %v491_v4  ;;  %v488_v8 = vld [vmem:[%s689_s1 + $0x28] sm:$0xff]   ;;  %v490_v10 = vld [vmem:[%s689_s1 + $0x38] sm:$0xff]   ;;  %v41_v11 = vld [vmem:[%s688_s0] sm:$0xf] }
  0x16   :  { %447 = vmatprep.subr.bf16.mxu0 %v546_v0  ;;  %467 = vmatprep.subr.bf16.mxu1 %v546_v0  ;;  %v42_v12 = vpack.c.bf16 %v41_v11, %v41_v11  ;;  %v493_v13 = vld [vmem:[#allocation2 + $0x10] sm:$0xff]   ;;  %v494_v14 = vld [vmem:[#allocation2 + $0x18] sm:$0xff]   ;;  %v497_v15 = vld [vmem:[%s693_s5 + $0x4] ss:$8 sps:$4 sm:$0xff]   ;;  %v261_v50 = vsub.s32 0, %v260_v49  ;;  %v265_v52 = vsub.s32 1, %v260_v49 }
  0x17   :  { %v400_v16 = vld [vmem:[%s690_s2] ss:$0 sm:$0xff]  ;;  %v500_v25 = vld [vmem:[%s693_s5 + $0x14] ss:$8 sps:$4 sm:$0xff]   ;;  %v498_v26 = vld [vmem:[%s693_s5 + $0x10] ss:$8 sps:$4 sm:$0xff]  }
  0x18   :  { %v495_v23 = vld [vmem:[%s693_s5] ss:$8 sps:$4 sm:$0xff]   ;;  %v503_v27 = vld [vmem:[%s693_s5 + $0x24] ss:$8 sps:$4 sm:$0xff]   ;;  %v506_v29 = vld [vmem:[%s693_s5 + $0x34] ss:$8 sps:$4 sm:$0xff]  }
  0x19   :  { %448 = vmatpush3.bf16.msra.mxu0 %v484_v2  ;;  %468 = vmatpush3.bf16.msra.mxu1 %v492_v6  ;;  %v501_v28 = vld [vmem:[%s693_s5 + $0x20] ss:$8 sps:$4 sm:$0xff]   ;;  %v504_v30 = vld [vmem:[%s693_s5 + $0x30] ss:$8 sps:$4 sm:$0xff]   ;;  %v509_v31 = vld [vmem:[%s693_s5 + $0x44] ss:$8 sps:$4 sm:$0xff]  }
  0x1a   :  { %449 = vmatprep.subr.bf16.mxu0 %v546_v0  ;;  %469 = vmatprep.subr.bf16.mxu1 %v546_v0  ;;  %v507_v32 = vld [vmem:[%s693_s5 + $0x40] ss:$8 sps:$4 sm:$0xff]   ;;  %v512_v33 = vld [vmem:[%s693_s5 + $0x54] ss:$8 sps:$4 sm:$0xff]   ;;  %v510_v34 = vld [vmem:[%s693_s5 + $0x50] ss:$8 sps:$4 sm:$0xff]  }
  0x1b   :  { %v515_v35 = vld [vmem:[%s693_s5 + $0x64] ss:$8 sps:$4 sm:$0xff]   ;;  %v513_v36 = vld [vmem:[%s693_s5 + $0x60] ss:$8 sps:$4 sm:$0xff]   ;;  %v518_v37 = vld [vmem:[%s693_s5 + $0x74] ss:$8 sps:$4 sm:$0xff]  }
  0x1c   :  { %v516_v38 = vld [vmem:[%s693_s5 + $0x70] ss:$8 sps:$4 sm:$0xff]   ;;  %v409_v40 = vld [vmem:[%s692_s4] ss:$0 sm:$0xff] }
  0x1d   :  { %450 = vmatpush3.bf16.msra.mxu0 %v485_v3  ;;  %470 = vmatpush3.bf16.msra.mxu1 %v493_v13  ;;  %v257_v51 = vld [vmem:[%s694_s6] sm:$0x3] }
  0x1e   :  { %451 = vmatprep.subr.bf16.mxu0 %v546_v0  ;;  %471 = vmatprep.subr.bf16.mxu1 %v546_v0  ;;  %v262_v53 = vrot.slane %v257_v51, %v261_v50  ;;  %v266_v54 = vrot.slane %v257_v51, %v265_v52 }
  0x21   :  { %452 = vmatpush3.bf16.msra.mxu0 %v486_v5  ;;  %472 = vmatpush3.bf16.msra.mxu1 %v494_v14 }
  0x22   :  { %453 = vmatprep.subr.bf16.mxu0 %v546_v0  ;;  %349 = vmatprep.subr.bf16.mxu1 %v497_v15 }
  0x25   :  { %454 = vmatpush3.bf16.msra.mxu0 %v487_v7 }
  0x26   :  { %455 = vmatprep.subr.bf16.mxu0 %v546_v0 }
  0x29   :  { %456 = vmatpush3.bf16.msra.mxu0 %v488_v8 }
  0x2a   :  { %457 = vmatprep.subr.bf16.mxu0 %v546_v0 }
  0x2d   :  { %458 = vmatpush3.bf16.msra.mxu0 %v489_v9 }
  0x2e   :  { %459 = vmatprep.subr.bf16.mxu0 %v546_v0 }
  0x31   :  { %460 = vmatpush3.bf16.msra.mxu0 %v490_v10 }
  0x34   :  { %462 = vmatmul.mubr.bf16.vlgmr.msra.gmra.mrb[0].mxu0 %v42_v12 }
 0x107   :  { %v148_v17 = vpop.f32.mrb[0].mxu0 }
 0x108   :  { %v149_v18 = vadd.f32 %v400_v16, %v148_v17  ;;  %v463_v19 = vpop.f32.mrb[1].mxu0 }
 0x109   :  { %v151_v20 = vpop.f32.mrb[2].mxu0 }
 0x10a   :  { %v154_v21 = vmax.f32 %v149_v18, 0.0  ;;  %v464_v22 = vpop.f32.mrb[3].mxu0 }
 0x10c   :  { %v155_v24 = vpack.c.bf16 %v154_v21, %v154_v21 }
 0x10e   :  { %474 = vmatmul.mubr.msk.bf16.vlgmr.msra.gmra.mrb[0].mxu1 %vm195_vm1, %v155_v24 }
 0x10f   :  { %350 = vmatpush1.bf16.msra.mxu1 %v495_v23  ;;  %381 = vmatprep.mubr.bf16.mxu1 %v548_v39 }
 0x110   :  { %351 = vmatprep.subr.bf16.mxu1 %v500_v25 }
 0x113   :  { %352 = vmatpush1.bf16.msra.mxu1 %v498_v26 }
 0x114   :  { %353 = vmatprep.subr.bf16.mxu1 %v503_v27 }
 0x117   :  { %354 = vmatpush1.bf16.msra.mxu1 %v501_v28 }
 0x118   :  { %355 = vmatprep.subr.bf16.mxu1 %v506_v29 }
 0x11b   :  { %356 = vmatpush1.bf16.msra.mxu1 %v504_v30 }
 0x11c   :  { %357 = vmatprep.subr.bf16.mxu1 %v509_v31 }
 0x11f   :  { %358 = vmatpush1.bf16.msra.mxu1 %v507_v32 }
 0x120   :  { %359 = vmatprep.subr.bf16.mxu1 %v512_v33 }
 0x123   :  { %360 = vmatpush1.bf16.msra.mxu1 %v510_v34 }
 0x124   :  { %361 = vmatprep.subr.bf16.mxu1 %v515_v35 }
 0x127   :  { %362 = vmatpush1.bf16.msra.mxu1 %v513_v36 }
 0x128   :  { %363 = vmatprep.subr.bf16.mxu1 %v518_v37 }
 0x12b   :  { %364 = vmatpush1.bf16.msra.mxu1 %v516_v38 }
 0x1e1   :  { %v233_v41 = vpop.f32.mrb[0].mxu1 }
 0x1e2   :  { %v234_v42 = vadd.f32 %v409_v40, %v233_v41  ;;  %v475_v43 = vpop.f32.mrb[1].mxu1 }
 0x1e3   :  { %v236_v44 = vpop.f32.mrb[2].mxu1 }
 0x1e4   :  { %v239_v45 = vmax.f32 %v234_v42, 0.0  ;;  %v476_v46 = vpop.f32.mrb[3].mxu1 }
 0x1e6   :  { %v240_v47 = vpack.c.bf16 %v239_v45, %v239_v45 }
 0x1e8   :  { %382 = vmatmul.mubr.bf16.vlgmr.msra.gmra.mrb[4].mxu1 %v240_v47 }
 0x2bb   :  { %v383_v55 = vpop.f32.mrb[4].mxu1 }
 0x2bc   :  { %v384_v56 = vadd.f32 %v383_v55, %v262_v53  ;;  %v385_v57 = vpop.f32.mrb[5].mxu1 }
 0x2bd   :  { %v386_v58 = vadd.f32 %v385_v57, %v266_v54  ;;  %v387_v59 = vpop.f32.mrb[6].mxu1 }
 0x2be   :  { %v388_v60 = vpop.f32.mrb[7].mxu1 }
 0x2bf   :  { %v392_v61 = vcombine.low %v384_v56, %v386_v58 }
 0x2c1   :  { %394 = vst [vmem:[%s695_s7] sm:$0xff] %v392_v61 }
 0x2c2   :  { %399 = vsyncpa [#allocation3], 1 }

</bundles_post_ra>
